<compile_context>
chip_gen: v6e
topology: v6e:2x2x1
jax: 0.10.0
libtpu: 0.0.40
codegen_flags: <defaults>
</compile_context>

<pallas_src>
import functools

import jax
import jax.numpy as jnp
from jax import lax
from jax.experimental import pallas as pl
from jax.experimental.pallas import tpu as pltpu

LN_EPS = 1e-5


def _cte_kernel(lhs_ref, w_ref, gmean_ref, prm_ref, out_ref):
    """Fused conv (one matmul) + per-token LayerNorm, lane-packed.

    lhs_ref   : (gt, pack*KKC)        bf16  -- `pack` tokens per row
    w_ref     : (pack*KKC, pack*Cout) bf16  -- block-diag kron(I_pack, W_eff)
    gmean_ref : (pack*Cout, pack*Cout) f32  -- block-diag group-average matrix
    prm_ref   : (8, pack*Cout)         f32  -- row 0 bias, row 1 gamma, row 2 beta
    out_ref   : (gt, pack*Cout)        f32
    """
    # Fused depthwise+pointwise conv == one MXU matmul, f32 accumulation.
    y = jnp.dot(lhs_ref[...], w_ref[...], preferred_element_type=jnp.float32)
    y = y + prm_ref[0:1, :]

    # Per-token LayerNorm over each 32-lane group; group stats via MXU matmul.
    # Two-pass variance ((y - mean)^2) -- numerically safer, free under DMA.
    mean = jnp.dot(y, gmean_ref[...], preferred_element_type=jnp.float32)
    d = y - mean
    var = jnp.dot(d * d, gmean_ref[...], preferred_element_type=jnp.float32)
    y_norm = d * lax.rsqrt(var + LN_EPS)

    out_ref[...] = (y_norm * prm_ref[1:2, :] + prm_ref[2:3, :]).astype(out_ref.dtype)


def _round_up(x, m):
    return ((x + m - 1) // m) * m


@functools.partial(
    jax.jit, static_argnames=("kernel_size", "stride", "padding", "token_tile"))
def _cte_forward(x_nchw, w_dw, b_dw, w_pw, b_pw, gamma, beta, *,
                 kernel_size, stride, padding, token_tile):
    B, Cin, H, W = x_nchw.shape
    K = kernel_size
    Cout = w_pw.shape[0]
    Ho = (H + 2 * padding - K) // stride + 1
    Wo = (W + 2 * padding - K) // stride + 1
    HW = Ho * Wo
    KK = K * K
    KKC = KK * Cin

    # Lane-packing factor: `pack` tokens per kernel row -> full-128-lane rows.
    pack = 128 // Cout if (Cout <= 128 and 128 % Cout == 0) else 1
    lane_w = pack * Cout

    # ---- fold depthwise into pointwise: one effective (KKC, Cout) weight ----
    wdw_kc = jnp.transpose(w_dw, (1, 2, 0)).reshape(KK, Cin)            # [k, c]
    w_eff = (wdw_kc[:, :, None] * jnp.transpose(w_pw)[None, :, :])      # (KK, Cin, Cout)
    w_eff = w_eff.reshape(KKC, Cout)
    b_eff = b_dw @ w_pw.T + b_pw                                        # (Cout,)

    eye = jnp.eye(pack, dtype=jnp.float32)
    w_bd = jnp.kron(eye, w_eff).astype(jnp.bfloat16)                    # (pack*KKC, lane_w)
    gmean = jnp.kron(eye, jnp.full((Cout, Cout), 1.0 / Cout, jnp.float32))
    prm = jnp.zeros((8, lane_w), jnp.float32)
    prm = prm.at[0].set(jnp.tile(b_eff.astype(jnp.float32), pack))
    prm = prm.at[1].set(jnp.tile(gamma.astype(jnp.float32), pack))
    prm = prm.at[2].set(jnp.tile(beta.astype(jnp.float32), pack))

    # ---- glue: bf16 NHWC pad + strided im2col -> (N, KKC), single bf16 build ----
    # TODO(synk): assemble the K*K taps in-kernel (manual DMA from the padded
    # NHWC image) to avoid the KK-fold im2col HBM inflation entirely.
    x_nhwc = jnp.transpose(x_nchw.astype(jnp.bfloat16), (0, 2, 3, 1))
    x_pad = jnp.pad(x_nhwc, ((0, 0), (padding, padding), (padding, padding), (0, 0)))
    taps = []
    for kh in range(K):
        for kw in range(K):
            taps.append(x_pad[:, kh:kh + Ho * stride:stride,
                              kw:kw + Wo * stride:stride, :])
    patches = jnp.stack(taps, axis=3)                    # (B, Ho, Wo, KK, Cin) bf16
    N = B * HW
    patches = patches.reshape(N, KKC)

    # ---- flatten batch x tokens into one flat grid axis, pad, lane-pack ----
    quantum = 8 * pack
    t = min(token_tile, _round_up(N, quantum))
    t = max(quantum, (t // quantum) * quantum)
    n_pad = _round_up(N, t)
    if n_pad != N:
        patches = jnp.pad(patches, ((0, n_pad - N), (0, 0)))
    lhs = patches.reshape(n_pad // pack, pack * KKC)     # free row-major reshape
    gt = t // pack                                       # rows per block (mult of 8)
    n_steps = n_pad // t

    cost = pl.CostEstimate(
        flops=(2 * n_pad * KKC * Cout                    # conv matmul
               + 2 * 2 * n_pad * Cout * lane_w           # two LN group matmuls
               + 8 * n_pad * Cout),                      # LN elementwise
        transcendentals=n_pad * Cout,                    # rsqrt lanes
        bytes_accessed=(n_pad * KKC * 2 + n_pad * Cout * 4
                        + pack * KKC * lane_w * 2 + lane_w * lane_w * 4
                        + 8 * lane_w * 4),
    )

    out = pl.pallas_call(
        _cte_kernel,
        out_shape=jax.ShapeDtypeStruct((n_pad // pack, lane_w), jnp.float32),
        grid_spec=pltpu.PrefetchScalarGridSpec(
            num_scalar_prefetch=0,
            grid=(n_steps,),
            in_specs=[
                pl.BlockSpec((gt, pack * KKC), lambda i: (i, 0)),
                pl.BlockSpec((pack * KKC, lane_w), lambda i: (0, 0)),
                pl.BlockSpec((lane_w, lane_w), lambda i: (0, 0)),
                pl.BlockSpec((8, lane_w), lambda i: (0, 0)),
            ],
            out_specs=pl.BlockSpec((gt, lane_w), lambda i: (i, 0)),
        ),
        compiler_params=pltpu.CompilerParams(
            dimension_semantics=("parallel",),
            vmem_limit_bytes=32 * 1024 * 1024,
        ),
        cost_estimate=cost,
    )(lhs, w_bd, gmean, prm)

    # Un-pack lanes -> tokens (bit-identical row-major reshape), drop padding.
    out = out.reshape(n_pad, Cout)[:N].reshape(B, HW, Cout)
    return out


def conv_token_embedding(x_nchw, params, *, kernel_size, stride, padding,
                         token_tile=4096):
    """Forward pass of ConvolutionalTokenEmbedding. Returns (tokens, h, w)."""
    w_dw, b_dw, w_pw, b_pw, gamma, beta = params
    _, _, H, W = x_nchw.shape
    Ho = (H + 2 * padding - kernel_size) // stride + 1
    Wo = (W + 2 * padding - kernel_size) // stride + 1
    out = _cte_forward(x_nchw, w_dw, b_dw, w_pw, b_pw, gamma, beta,
                       kernel_size=kernel_size, stride=stride, padding=padding,
                       token_tile=token_tile)
    return out, Ho, Wo


def _reference(x_nchw, params, *, kernel_size, stride, padding):
    """Pure-JAX f32 reference mirroring the PyTorch module (for validation)."""
    w_dw, b_dw, w_pw, b_pw, gamma, beta = params
    Cin = x_nchw.shape[1]
    dw = lax.conv_general_dilated(
        x_nchw, w_dw[:, None, :, :],                 # (Cin,1,K,K) OIHW
        window_strides=(stride, stride),
        padding=((padding, padding), (padding, padding)),
        feature_group_count=Cin,
        dimension_numbers=("NCHW", "OIHW", "NCHW"))
    dw = dw + b_dw[None, :, None, None]
    pw = jnp.einsum("bchw,oc->bohw", dw, w_pw) + b_pw[None, :, None, None]
    b, c, h, w = pw.shape
    tok = jnp.transpose(pw, (0, 2, 3, 1)).reshape(b, h * w, c)
    mean = jnp.mean(tok, axis=-1, keepdims=True)
    var = jnp.mean((tok - mean) ** 2, axis=-1, keepdims=True)
    tok = (tok - mean) / jnp.sqrt(var + LN_EPS)
    tok = tok * gamma + beta
    return tok, h, w


if __name__ == "__main__":
    # Small shapes consistent with the module.
    B, Cin, H, W = 2, 4, 16, 16
    Cout, K, STRIDE, PAD = 32, 3, 2, 1

    key = jax.random.PRNGKey(0)
    kx, k1, k2, k3, k4 = jax.random.split(key, 5)

    x = jax.random.normal(kx, (B, Cin, H, W), dtype=jnp.float32)

    # Deterministic synthetic parameters (shapes follow nn.Conv2d / nn.LayerNorm).
    w_dw = 0.1 * jax.random.normal(k1, (Cin, K, K), dtype=jnp.float32)   # depthwise
    b_dw = 0.1 * jax.random.normal(k2, (Cin,), dtype=jnp.float32)
    w_pw = 0.1 * jax.random.normal(k3, (Cout, Cin), dtype=jnp.float32)   # pointwise
    b_pw = 0.1 * jax.random.normal(k4, (Cout,), dtype=jnp.float32)
    gamma = jnp.ones((Cout,), dtype=jnp.float32)                          # LN default init
    beta = jnp.zeros((Cout,), dtype=jnp.float32)
    params = (w_dw, b_dw, w_pw, b_pw, gamma, beta)

    out, h, w = conv_token_embedding(x, params,
                                     kernel_size=K, stride=STRIDE, padding=PAD)
    out = jax.block_until_ready(out)

    ref, h_ref, w_ref = _reference(x, params, kernel_size=K, stride=STRIDE, padding=PAD)
    assert (h, w) == (h_ref, w_ref)
    assert out.shape == (B, h * w, Cout)
    # bf16 MXU operands vs the pure-f32 reference -> bf16-level tolerance.
    err = float(jnp.max(jnp.abs(out - ref)))
    assert err < 5e-2, err

    print("KERNEL_OK")
</pallas_src>

<mosaic_0001>
module attributes {stable_mosaic.version = 11 : i64} {
  func.func @_cte_kernel(%arg0: i32, %arg1: memref<32x144xbf16, #tpu.memory_space<vmem>>, %arg2: memref<144x128xbf16, #tpu.memory_space<vmem>>, %arg3: memref<128x128xf32, #tpu.memory_space<vmem>>, %arg4: memref<8x128xf32, #tpu.memory_space<vmem>>, %arg5: memref<32x128xf32, #tpu.memory_space<vmem>>) attributes {dimension_semantics = [#tpu.dimension_semantics<parallel>], iteration_bounds = array<i64: 1>, scalar_prefetch = 0 : i64, scratch_operands = 0 : i64, tpu.core_type = #tpu.core_type<tc>, window_params = [{transform_indices = @transform_0, window_bounds = array<i64: 32, 144>}, {pipeline_mode = #tpu.pipeline_mode<synchronous>, transform_indices = @transform_1, window_bounds = array<i64: 144, 128>}, {pipeline_mode = #tpu.pipeline_mode<synchronous>, transform_indices = @transform_2, window_bounds = array<i64: 128, 128>}, {pipeline_mode = #tpu.pipeline_mode<synchronous>, transform_indices = @transform_3, window_bounds = array<i64: 8, 128>}, {transform_indices = @transform_4, window_bounds = array<i64: 32, 128>}]} {
    %c0 = arith.constant 0 : index
    %c0_0 = arith.constant 0 : index
    %0 = vector.load %arg1[%c0, %c0_0] : memref<32x144xbf16, #tpu.memory_space<vmem>>, vector<32x144xbf16>
    %c0_1 = arith.constant 0 : index
    %c0_2 = arith.constant 0 : index
    %1 = vector.load %arg2[%c0_1, %c0_2] : memref<144x128xbf16, #tpu.memory_space<vmem>>, vector<144x128xbf16>
    %cst = arith.constant dense<0.000000e+00> : vector<32x128xf32>
    %2 = tpu.matmul %0, %1, %cst {dimension_numbers = #tpu.dot_dimension_numbers<[1], [0], [0], [1], [0, 0, 1, 1], [], []>} : vector<32x144xbf16>, vector<144x128xbf16>, vector<32x128xf32> -> vector<32x128xf32>
    %c0_3 = arith.constant 0 : index
    %c0_4 = arith.constant 0 : index
    %3 = vector.load %arg4[%c0_3, %c0_4] : memref<8x128xf32, #tpu.memory_space<vmem>>, vector<1x128xf32>
    %4 = vector.broadcast %3 : vector<1x128xf32> to vector<32x128xf32>
    %5 = arith.addf %2, %4 : vector<32x128xf32>
    %c0_5 = arith.constant 0 : index
    %c0_6 = arith.constant 0 : index
    %6 = vector.load %arg3[%c0_5, %c0_6] : memref<128x128xf32, #tpu.memory_space<vmem>>, vector<128x128xf32>
    %cst_7 = arith.constant dense<0.000000e+00> : vector<32x128xf32>
    %7 = tpu.matmul %5, %6, %cst_7 {dimension_numbers = #tpu.dot_dimension_numbers<[1], [0], [0], [1], [0, 0, 1, 1], [], []>} : vector<32x128xf32>, vector<128x128xf32>, vector<32x128xf32> -> vector<32x128xf32>
    %8 = arith.subf %5, %7 : vector<32x128xf32>
    %9 = arith.mulf %8, %8 : vector<32x128xf32>
    %c0_8 = arith.constant 0 : index
    %c0_9 = arith.constant 0 : index
    %10 = vector.load %arg3[%c0_8, %c0_9] : memref<128x128xf32, #tpu.memory_space<vmem>>, vector<128x128xf32>
    %cst_10 = arith.constant dense<0.000000e+00> : vector<32x128xf32>
    %11 = tpu.matmul %9, %10, %cst_10 {dimension_numbers = #tpu.dot_dimension_numbers<[1], [0], [0], [1], [0, 0, 1, 1], [], []>} : vector<32x128xf32>, vector<128x128xf32>, vector<32x128xf32> -> vector<32x128xf32>
    %cst_11 = arith.constant 9.99999974E-6 : f32
    %12 = vector.broadcast %cst_11 : f32 to vector<32x128xf32>
    %13 = arith.addf %11, %12 : vector<32x128xf32>
    %14 = math.rsqrt %13 : vector<32x128xf32>
    %15 = arith.mulf %8, %14 : vector<32x128xf32>
    %c1 = arith.constant 1 : index
    %c0_12 = arith.constant 0 : index
    %16 = vector.load %arg4[%c1, %c0_12] : memref<8x128xf32, #tpu.memory_space<vmem>>, vector<1x128xf32>
    %17 = vector.broadcast %16 : vector<1x128xf32> to vector<32x128xf32>
    %18 = arith.mulf %15, %17 : vector<32x128xf32>
    %c2 = arith.constant 2 : index
    %c0_13 = arith.constant 0 : index
    %19 = vector.load %arg4[%c2, %c0_13] : memref<8x128xf32, #tpu.memory_space<vmem>>, vector<1x128xf32>
    %20 = vector.broadcast %19 : vector<1x128xf32> to vector<32x128xf32>
    %21 = arith.addf %18, %20 : vector<32x128xf32>
    %c0_14 = arith.constant 0 : index
    %c0_15 = arith.constant 0 : index
    %22 = vector.load %arg5[%c0_14, %c0_15] : memref<32x128xf32, #tpu.memory_space<vmem>>, vector<32x128xf32>
    tpu.vector_store %arg5[%c0_14, %c0_15], %21 {strides = array<i32>} : memref<32x128xf32, #tpu.memory_space<vmem>>, vector<32x128xf32>,
    return
  }
  func.func @transform_0(%arg0: i32) -> (i32, i32) {
    %c0_i32 = arith.constant 0 : i32
    %c0_i32_0 = arith.constant 0 : i32
    return %arg0, %c0_i32 : i32, i32
  }
  func.func @transform_1(%arg0: i32) -> (i32, i32) {
    %c0_i32 = arith.constant 0 : i32
    %c0_i32_0 = arith.constant 0 : i32
    %c0_i32_1 = arith.constant 0 : i32
    return %c0_i32, %c0_i32_0 : i32, i32
  }
  func.func @transform_2(%arg0: i32) -> (i32, i32) {
    %c0_i32 = arith.constant 0 : i32
    %c0_i32_0 = arith.constant 0 : i32
    %c0_i32_1 = arith.constant 0 : i32
    return %c0_i32, %c0_i32_0 : i32, i32
  }
  func.func @transform_3(%arg0: i32) -> (i32, i32) {
    %c0_i32 = arith.constant 0 : i32
    %c0_i32_0 = arith.constant 0 : i32
    %c0_i32_1 = arith.constant 0 : i32
    return %c0_i32, %c0_i32_0 : i32, i32
  }
  func.func @transform_4(%arg0: i32) -> (i32, i32) {
    %c0_i32 = arith.constant 0 : i32
    %c0_i32_0 = arith.constant 0 : i32
    return %arg0, %c0_i32 : i32, i32
  }
}

</mosaic_0001>

<bundles_post_ra>
// kernel: tile.18
= control target key start
LH: loop header
LB: loop body
LE: loop exit
PB: predicated region body
PF: predicated region fallthrough
CT: control target
= control target key end

     0   :  { %s22_s0 = inlined_call_operand.vmem [shape: f32[32], index: 0, kind: input, shape index: {}]   ;;  %s23_s1 = inlined_call_operand.vmem [shape: f32[4,32], index: 1, kind: output, shape index: {}]  }
   0x1   :  { %v4_v0 = vld [vmem:[%s22_s0] ss:$0 sm:$0xff] }
   0x2   :  { %5 = vst [vmem:[%s23_s1] sm:$0xf] %v4_v0 }

// kernel: _cte_forward.1
= control target key start
LH: loop header
LB: loop body
LE: loop exit
PB: predicated region body
PF: predicated region fallthrough
CT: control target
= control target key end

     0   :  { %v559_v0 = vmov 0   ;;  %vm117_vm0 = vcmask 130048   ;;  %s767_s1 = inlined_call_operand.vmem [shape: bf16[144,128], index: 1, kind: input, shape index: {}]   ;;  %s768_s0 = inlined_call_operand.vmem [shape: bf16[32,144], index: 0, kind: input, shape index: {}]   ;;  %s769_s2 = inlined_call_operand.vmem [shape: f32[128,128], index: 2, kind: input, shape index: {}]   ;;  %s770_s3 = inlined_call_operand.vmem [shape: f32[8,128], index: 3, kind: input, shape index: {}]   ;;  %s771_s4 = inlined_call_operand.vmem [shape: f32[32,128], index: 4, kind: output, shape index: {}]  }
   0x1   :  { %124 = vmatprep.subr.bf16.mxu0 %v559_v0  ;;  %v536_v1 = vld [vmem:[%s767_s1 + $0x38] sm:$0xff]   ;;  %v537_v2 = vld [vmem:[%s767_s1 + $0x30] sm:$0xff]   ;;  %v538_v3 = vld [vmem:[%s767_s1 + $0x28] sm:$0xff]  }
   0x2   :  { %125 = vmatpush1.bf16.msra.mxu0 %v536_v1  ;;  %v539_v4 = vld [vmem:[%s767_s1 + $0x20] sm:$0xff]   ;;  %v603_v6 = vld [vmem:[%s769_s2 + $0x78] sm:$0xff]  ;;  %v610_v7 = vld [vmem:[%s769_s2 + $0x70] sm:$0xff] }
   0x3   :  { %126 = vmatprep.subr.bf16.mxu0 %v559_v0  ;;  %v547_v5 = vld [vmem:[%s768_s0 + $0x4] ss:$8 sps:$4 sm:$0xff]   ;;  %459 = vmatprep.subr.mxu1 %v603_v6  ;;  %v540_v9 = vld [vmem:[%s767_s1 + $0x18] sm:$0xff]   ;;  %v541_v12 = vld [vmem:[%s767_s1 + $0x10] sm:$0xff]  }
   0x4   :  { %415 = vmatprep.mubr.msk.bf16.mxu0 %vm117_vm0, %v547_v5  ;;  %460 = vmatpush3.msra.mxu1 %v603_v6  ;;  %v616_v8 = vld [vmem:[%s769_s2 + $0x68] sm:$0xff]  ;;  %v626_v10 = vld [vmem:[%s769_s2 + $0x60] sm:$0xff]  ;;  %v633_v11 = vld [vmem:[%s769_s2 + $0x58] sm:$0xff] }
   0x5   :  { %461 = vmatprep.subr.mxu1 %v610_v7  ;;  %v643_v13 = vld [vmem:[%s769_s2 + $0x50] sm:$0xff]  ;;  %v650_v14 = vld [vmem:[%s769_s2 + $0x48] sm:$0xff]  ;;  %v660_v16 = vld [vmem:[%s769_s2 + $0x40] sm:$0xff] }
   0x6   :  { %127 = vmatpush1.bf16.msra.mxu0 %v537_v2  ;;  %462 = vmatpush3.msra.mxu1 %v610_v7  ;;  %v542_v15 = vld [vmem:[%s767_s1 + $0x8] sm:$0xff]   ;;  %v667_v17 = vld [vmem:[%s769_s2 + $0x38] sm:$0xff]  ;;  %v543_v18 = vld [vmem:[%s767_s1] sm:$0xff]  }
   0x7   :  { %128 = vmatprep.subr.bf16.mxu0 %v559_v0  ;;  %463 = vmatprep.subr.mxu1 %v616_v8  ;;  %v677_v19 = vld [vmem:[%s769_s2 + $0x30] sm:$0xff]  ;;  %v684_v20 = vld [vmem:[%s769_s2 + $0x28] sm:$0xff]  ;;  %v544_v21 = vld [vmem:[%s767_s1 + $0x40] sm:$0xff]  }
   0x8   :  { %464 = vmatpush3.msra.mxu1 %v616_v8  ;;  %v694_v22 = vld [vmem:[%s769_s2 + $0x20] sm:$0xff]  ;;  %v176_v24 = vld [vmem:[%s769_s2 + $0x18] sm:$0xff]  ;;  %v175_v27 = vld [vmem:[%s769_s2 + $0x10] sm:$0xff] }
   0x9   :  { %465 = vmatprep.subr.mxu1 %v626_v10  ;;  %v545_v23 = vld [vmem:[%s768_s0] ss:$8 sps:$4 sm:$0xff]   ;;  %v548_v25 = vld [vmem:[%s768_s0 + $0x14] ss:$8 sps:$4 sm:$0xff]   ;;  %v550_v26 = vld [vmem:[%s768_s0 + $0x10] ss:$8 sps:$4 sm:$0xff]  }
   0xa   :  { %129 = vmatpush1.bf16.msra.mxu0 %v538_v3  ;;  %466 = vmatpush3.msra.mxu1 %v626_v10  ;;  %v174_v28 = vld [vmem:[%s769_s2 + $0x8] sm:$0xff]  ;;  %v173_v29 = vld [vmem:[%s769_s2] sm:$0xff] }
   0xb   :  { %130 = vmatprep.subr.bf16.mxu0 %v559_v0  ;;  %467 = vmatprep.subr.mxu1 %v633_v11  ;;  %v401_v30 = vld [vmem:[%s770_s3] ss:$0 sm:$0xff]  ;;  %v418_v3 = vld [vmem:[%s770_s3 + $0x2] ss:$0 sm:$0xff] }
   0xc   :  { %468 = vmatpush3.msra.mxu1 %v633_v11 }
   0xd   :  { %469 = vmatprep.subr.mxu1 %v643_v13 }
   0xe   :  { %131 = vmatpush1.bf16.msra.mxu0 %v539_v4  ;;  %470 = vmatpush3.msra.mxu1 %v643_v13 }
   0xf   :  { %132 = vmatprep.subr.bf16.mxu0 %v559_v0  ;;  %471 = vmatprep.subr.mxu1 %v650_v14 }
  0x10   :  { %472 = vmatpush3.msra.mxu1 %v650_v14 }
  0x11   :  { %473 = vmatprep.subr.mxu1 %v660_v16 }
  0x12   :  { %133 = vmatpush1.bf16.msra.mxu0 %v540_v9  ;;  %474 = vmatpush3.msra.mxu1 %v660_v16 }
  0x13   :  { %134 = vmatprep.subr.bf16.mxu0 %v559_v0  ;;  %475 = vmatprep.subr.mxu1 %v667_v17 }
  0x14   :  { %476 = vmatpush3.msra.mxu1 %v667_v17 }
  0x15   :  { %477 = vmatprep.subr.mxu1 %v677_v19 }
  0x16   :  { %135 = vmatpush1.bf16.msra.mxu0 %v541_v12  ;;  %478 = vmatpush3.msra.mxu1 %v677_v19 }
  0x17   :  { %136 = vmatprep.subr.bf16.mxu0 %v559_v0  ;;  %479 = vmatprep.subr.mxu1 %v684_v20 }
  0x18   :  { %480 = vmatpush3.msra.mxu1 %v684_v20 }
  0x19   :  { %481 = vmatprep.subr.mxu1 %v694_v22 }
  0x1a   :  { %137 = vmatpush1.bf16.msra.mxu0 %v542_v15  ;;  %482 = vmatpush3.msra.mxu1 %v694_v22 }
  0x1b   :  { %138 = vmatprep.subr.bf16.mxu0 %v559_v0  ;;  %483 = vmatprep.subr.mxu1 %v176_v24 }
  0x1c   :  { %484 = vmatpush3.msra.mxu1 %v176_v24 }
  0x1d   :  { %485 = vmatprep.subr.mxu1 %v175_v27 }
  0x1e   :  { %139 = vmatpush1.bf16.msra.mxu0 %v543_v18  ;;  %486 = vmatpush3.msra.mxu1 %v175_v27 }
  0x1f   :  { %154 = vmatprep.subr.bf16.mxu0 %v559_v0  ;;  %487 = vmatprep.subr.mxu1 %v174_v28  ;;  %v417_v0 = vld [vmem:[%s770_s3 + $0x1] ss:$0 sm:$0xff] }
  0x20   :  { %488 = vmatpush3.msra.mxu1 %v174_v28 }
  0x21   :  { %489 = vmatprep.subr.mxu1 %v173_v29 }
  0x22   :  { %155 = vmatpush2.bf16.msra.mxu0 %v544_v21  ;;  %490 = vmatpush3.msra.mxu1 %v173_v29 }
  0x23   :  { %497 = vmatprep.subr.mxu1 %v603_v6 }
  0x25   :  { %157 = vmatmul.mubr.bf16.vlgmr.msra.gmra.mxu0 %v545_v23 }
  0x26   :  { %416 = vmatprep.mubr.msk.bf16.mxu0 %vm117_vm0, %v548_v25 }
  0x2d   :  { %165 = vmatmul.mubr.bf16.gmra.mxu0 %v550_v26 }
  0xe5   :  { %v158_v31 = vpop.f32.mrf.mxu0 }
  0xe6   :  { %v159_v32 = vadd.f32 %v401_v30, %v158_v31 }
  0xe7   :  { %v160_v33 = vpop.f32.mrf.mxu0 }
  0xe8   :  { %491 = vmatprep.mubr.f32.mxu1 %v159_v32 }
  0xe9   :  { %v161_v34 = vpop.f32.mrf.mxu0 }
  0xea   :  { %v162_v35 = vadd.f32 %v401_v30, %v161_v34 }
  0xeb   :  { %v163_v36 = vpop.f32.mrf.mxu0 }
  0xec   :  { %492 = vmatmul.mubr.f32.vlgmr.msra.gmra.mxu1 %v162_v35 }
  0xed   :  { %v166_v37 = vpop.f32.mrf.mxu0  ;;  %498 = vmatpush3.msra.mxu1 %v603_v6 }
  0xee   :  { %v167_v38 = vadd.f32 %v401_v30, %v166_v37  ;;  %499 = vmatprep.subr.mxu1 %v610_v7 }
  0xef   :  { %v168_v39 = vpop.f32.mrf.mxu0  ;;  %500 = vmatpush3.msra.mxu1 %v610_v7 }
  0xf0   :  { %494 = vmatprep.mubr.f32.mxu1 %v167_v38  ;;  %501 = vmatprep.subr.mxu1 %v616_v8 }
  0xf1   :  { %v169_v40 = vpop.f32.mrf.mxu0  ;;  %502 = vmatpush3.msra.mxu1 %v616_v8 }
  0xf2   :  { %v170_v41 = vadd.f32 %v401_v30, %v169_v40  ;;  %503 = vmatprep.subr.mxu1 %v626_v10 }
  0xf3   :  { %v171_v42 = vpop.f32.mrf.mxu0  ;;  %504 = vmatpush3.msra.mxu1 %v626_v10 }
  0xf4   :  { %495 = vmatmul.mubr.f32.gmra.mxu1 %v170_v41  ;;  %505 = vmatprep.subr.mxu1 %v633_v11 }
  0xf5   :  { %506 = vmatpush3.msra.mxu1 %v633_v11 }
  0xf6   :  { %507 = vmatprep.subr.mxu1 %v643_v13 }
  0xf7   :  { %508 = vmatpush3.msra.mxu1 %v643_v13 }
  0xf8   :  { %509 = vmatprep.subr.mxu1 %v650_v14 }
  0xf9   :  { %510 = vmatpush3.msra.mxu1 %v650_v14 }
  0xfa   :  { %511 = vmatprep.subr.mxu1 %v660_v16 }
  0xfb   :  { %512 = vmatpush3.msra.mxu1 %v660_v16 }
  0xfc   :  { %513 = vmatprep.subr.mxu1 %v667_v17 }
  0xfd   :  { %514 = vmatpush3.msra.mxu1 %v667_v17 }
  0xfe   :  { %515 = vmatprep.subr.mxu1 %v677_v19 }
  0xff   :  { %516 = vmatpush3.msra.mxu1 %v677_v19 }
 0x100   :  { %517 = vmatprep.subr.mxu1 %v684_v20 }
 0x101   :  { %518 = vmatpush3.msra.mxu1 %v684_v20 }
 0x102   :  { %519 = vmatprep.subr.mxu1 %v694_v22 }
 0x103   :  { %520 = vmatpush3.msra.mxu1 %v694_v22 }
 0x104   :  { %521 = vmatprep.subr.mxu1 %v176_v24 }
 0x105   :  { %522 = vmatpush3.msra.mxu1 %v176_v24 }
 0x106   :  { %523 = vmatprep.subr.mxu1 %v175_v27 }
 0x107   :  { %524 = vmatpush3.msra.mxu1 %v175_v27 }
 0x108   :  { %525 = vmatprep.subr.mxu1 %v174_v28 }
 0x109   :  { %526 = vmatpush3.msra.mxu1 %v174_v28 }
 0x10a   :  { %527 = vmatprep.subr.mxu1 %v173_v29 }
 0x10b   :  { %528 = vmatpush3.msra.mxu1 %v173_v29 }
 0x1ac   :  { %v493_v43 = vpop.f32.mrf.mxu1 }
 0x1ad   :  { %v275_v44 = vsub.f32 %v162_v35, %v493_v43 }
 0x1ae   :  { %v255_v45 = vpop.f32.mrf.mxu1 }
 0x1af   :  { %v274_v46 = vsub.f32 %v159_v32, %v255_v45  ;;  %v279_v48 = vmul.f32 %v275_v44, %v275_v44 }
 0x1b1   :  { %v278_v47 = vmul.f32 %v274_v46, %v274_v46 }
 0x1b3   :  { %529 = vmatprep.mubr.f32.mxu1 %v278_v47 }
 0x1b4   :  { %v496_v49 = vpop.f32.mrf.mxu1  ;;  %530 = vmatmul.mubr.f32.vlgmr.msra.gmra.mxu1 %v279_v48 }
 0x1b5   :  { %v277_v50 = vsub.f32 %v170_v41, %v496_v49 }
 0x1b6   :  { %v265_v51 = vpop.f32.mrf.mxu1 }
 0x1b7   :  { %v276_v52 = vsub.f32 %v167_v38, %v265_v51  ;;  %v281_v54 = vmul.f32 %v277_v50, %v277_v50 }
 0x1b9   :  { %v280_v53 = vmul.f32 %v276_v52, %v276_v52 }
 0x1bb   :  { %532 = vmatprep.mubr.f32.mxu1 %v280_v53 }
 0x1bc   :  { %533 = vmatmul.mubr.f32.gmra.mxu1 %v281_v54 }
 0x274   :  { %v531_v55 = vpop.f32.mrf.mxu1 }
 0x275   :  { %v354_v56 = vadd.f32 1e-05, %v531_v55 }
 0x276   :  { %v348_v57 = vpop.f32.mrf.mxu1 }
 0x277   :  { %551 = vrsqrt.f32 %v354_v56  ;;  %v349_v58 = vadd.f32 1e-05, %v348_v57 }
 0x279   :  { %553 = vrsqrt.f32 %v349_v58 }
 0x27c   :  { %v534_v59 = vpop.f32.mrf.mxu1 }
 0x27d   :  { %v364_v60 = vadd.f32 1e-05, %v534_v59 }
 0x27e   :  { %v358_v61 = vpop.f32.mrf.mxu1 }
 0x27f   :  { %555 = vrsqrt.f32 %v364_v60  ;;  %v359_v62 = vadd.f32 1e-05, %v358_v61 }
 0x281   :  { %557 = vrsqrt.f32 %v359_v62 }
 0x284   :  { %v552_v63 = vpop.eup %551 }
 0x285   :  { %v372_v1 = vmul.f32 %v552_v63, %v275_v44 }
 0x286   :  { %v554_v2 = vpop.eup %553 }
 0x287   :  { %v381_v4 = vmul.f32 %v417_v0, %v372_v1  ;;  %v371_v5 = vmul.f32 %v554_v2, %v274_v46 }
 0x289   :  { %v390_v6 = vadd.f32 %v418_v3, %v381_v4  ;;  %v380_v7 = vmul.f32 %v417_v0, %v371_v5 }
 0x28b   :  { %394 = vst [vmem:[%s771_s4 + $0x8] sm:$0xff] %v390_v6  ;;  %v389_v8 = vadd.f32 %v418_v3, %v380_v7 }
 0x28c   :  { %v556_v9 = vpop.eup %555 }
 0x28d   :  { %393 = vst [vmem:[%s771_s4] sm:$0xff] %v389_v8  ;;  %v374_v10 = vmul.f32 %v556_v9, %v277_v50 }
 0x28e   :  { %v558_v11 = vpop.eup %557 }
 0x28f   :  { %v383_v12 = vmul.f32 %v417_v0, %v374_v10  ;;  %v373_v13 = vmul.f32 %v558_v11, %v276_v52 }
 0x291   :  { %v392_v14 = vadd.f32 %v418_v3, %v383_v12  ;;  %v382_v15 = vmul.f32 %v417_v0, %v373_v13 }
 0x293   :  { %396 = vst [vmem:[%s771_s4 + $0x18] sm:$0xff] %v392_v14  ;;  %v391_v16 = vadd.f32 %v418_v3, %v382_v15 }
 0x295   :  { %395 = vst [vmem:[%s771_s4 + $0x10] sm:$0xff] %v391_v16 }

</bundles_post_ra>
